<compile_context>
chip_gen: v5e
topology: v5e:2x2
jax: 0.10.0
libtpu: 0.0.40
codegen_flags: <defaults>
</compile_context>

<pallas_src>
import numpy as np
import jax
import jax.numpy as jnp
from jax import lax
from jax.experimental import pallas as pl
from jax.experimental.pallas import tpu as pltpu

# At least this many grid steps when the data allows it: >= 2 steps per
# TensorCore on v7x's 2 TCs, and enough steps for in/out DMA overlap on
# every generation (costs nothing on v5e/v6e).
_MIN_GRID_STEPS = 4


def _cdiv(a: int, b: int) -> int:
    return -(-a // b)


def _vmem_limits() -> tuple[int, int]:
    """(vmem_limit_bytes, block_budget_bytes), generation-aware."""
    try:
        phys = int(pltpu.get_tpu_info().vmem_capacity_bytes)
    except Exception:
        phys = 64 * 1024 * 1024  # conservative fallback (v7x per-TC VMEM)
    limit = int(phys * 3 // 4)    # ~0.75x physical; v5e/v6e ~96 MiB, v7x ~48 MiB
    budget = int(limit * 4 // 5)  # ~0.8x limit; headroom for Mosaic scratch
    return limit, budget


def _choose_tiling(B: int, H: int, W: int, T: int, itemsize: int,
                   budget: int) -> tuple[int, int, int]:
    """Pick (pages_per_block P, row_tile TH, num_row_tiles)."""
    # Double-buffered input + output blocks per page (full-height blocks).
    per_page = 2 * (H * W + T * T) * itemsize
    p_fit = max(1, budget // per_page)

    if B >= _MIN_GRID_STEPS:
        # The page axis alone provides enough steps: biggest P that fits the
        # VMEM budget while still leaving >= _MIN_GRID_STEPS steps.
        P = max(1, min(p_fit, B // _MIN_GRID_STEPS))
        return int(P), int(T), 1

    # Few pages (e.g. a single 3-channel image): keep every page in one block
    # and split the *output rows* to restore pipelining / megacore sharding.
    P = int(min(B, p_fit))
    page_steps = _cdiv(B, P)
    need = _cdiv(_MIN_GRID_STEPS, page_steps)
    TH = max(8, (T // need) // 8 * 8)  # row tile: multiple of 8 sublanes
    if TH >= T or T < 16:
        return P, int(T), 1
    return P, int(TH), int(_cdiv(T, TH))


def _make_simple_kernel(H: int, W: int, T: int):
    """Kernel over a (P, H, W) input block and (P, T, T) output block."""

    def kernel(x_ref, o_ref):
        P = o_ref.shape[0]
        dt = o_ref.dtype
        # Straight load -> store of the valid region (no concat temporaries);
        # pads are written exactly once each, corner never double-written.
        o_ref[:, :H, :W] = x_ref[...]
        if W < T:
            o_ref[:, :H, W:] = jnp.zeros((P, H, T - W), dt)
        if H < T:
            o_ref[:, H:, :] = jnp.zeros((P, T - H, T), dt)

    return kernel


def _make_row_tiled_kernel(H: int, W: int, T: int, TH: int):
    """Kernel over a (P, TH, W) input block and (P, TH, T) output block.

    The input row block index is clamped in the index_map, so pure-pad row
    tiles re-DMA the last valid input row block (auto-pipelined DMAs cannot
    be skipped); the kernel simply ignores that data and writes zeros.
    """

    def kernel(x_ref, o_ref):
        P = o_ref.shape[0]
        dt = o_ref.dtype
        row0 = pl.program_id(1) * TH        # first output row of this tile
        n_valid = H - row0                  # input rows overlapping this tile

        if W < T:
            o_ref[:, :, W:] = jnp.zeros((P, TH, T - W), dt)

        @pl.when(n_valid >= TH)             # tile fully inside the image
        def _():
            o_ref[:, :, :W] = x_ref[...]

        @pl.when(jnp.logical_and(n_valid > 0, n_valid < TH))  # boundary tile
        def _():
            rows = lax.broadcasted_iota(jnp.int32, (P, TH, W), 1)
            o_ref[:, :, :W] = jnp.where(rows < n_valid, x_ref[...],
                                        jnp.zeros((), dt))

        @pl.when(n_valid <= 0)              # pure-pad tile below the image
        def _():
            o_ref[:, :, :W] = jnp.zeros((P, TH, W), dt)

    return kernel


def pad_to_square(image: jax.Array, target_size: int) -> jax.Array:
    """Pallas equivalent of PadToSquare(target_size)(image) (zero pad, NCHW)."""
    *lead, H, W = image.shape
    T = int(target_size)
    assert H <= T and W <= T, "PadToSquare only pads (no cropping supported)"

    if H == T and W == T:                   # nothing to pad
        return image

    B = int(np.prod(lead)) if lead else 1
    x = image.reshape(B, H, W)
    itemsize = x.dtype.itemsize

    vmem_limit, budget = _vmem_limits()
    P, TH, row_tiles = _choose_tiling(B, H, W, T, itemsize, budget)
    page_steps = _cdiv(B, P)

    cost = pl.CostEstimate(flops=0, transcendentals=0,
                           bytes_accessed=(B * H * W + B * T * T) * itemsize)

    if row_tiles == 1:
        out = pl.pallas_call(
            _make_simple_kernel(H, W, T),
            out_shape=jax.ShapeDtypeStruct((B, T, T), image.dtype),
            grid=(page_steps,),
            in_specs=[pl.BlockSpec((P, H, W), lambda i: (i, 0, 0))],
            out_specs=pl.BlockSpec((P, T, T), lambda i: (i, 0, 0)),
            compiler_params=pltpu.CompilerParams(
                dimension_semantics=("parallel",),
                vmem_limit_bytes=vmem_limit),
            cost_estimate=cost,
        )(x)
    else:
        max_in_row_blk = _cdiv(H, TH) - 1   # clamp keeps the input DMA in-bounds
        out = pl.pallas_call(
            _make_row_tiled_kernel(H, W, T, TH),
            out_shape=jax.ShapeDtypeStruct((B, T, T), image.dtype),
            grid=(page_steps, row_tiles),
            in_specs=[pl.BlockSpec(
                (P, TH, W),
                lambda i, j: (i, jnp.minimum(j, max_in_row_blk), 0))],
            out_specs=pl.BlockSpec((P, TH, T), lambda i, j: (i, j, 0)),
            compiler_params=pltpu.CompilerParams(
                dimension_semantics=("parallel", "parallel"),
                vmem_limit_bytes=vmem_limit),
            cost_estimate=cost,
        )(x)

    return out.reshape(*lead, T, T)


if __name__ == "__main__":
    # Case 1: batched NCHW input -> page-tiled (simple) path.
    B, C, H, W = 2, 4, 16, 16
    T1 = 32
    x1 = jax.random.normal(jax.random.PRNGKey(0), (B, C, H, W), dtype=jnp.float32)
    y1 = jax.block_until_ready(pad_to_square(x1, T1))
    ref1 = jnp.pad(x1, ((0, 0), (0, 0), (0, T1 - H), (0, T1 - W)),
                   constant_values=0.0)
    assert y1.shape == (B, C, T1, T1), y1.shape
    assert y1.dtype == x1.dtype
    np.testing.assert_allclose(np.asarray(y1), np.asarray(ref1), rtol=0, atol=0)

    # Case 2: single 3-channel image with H not a multiple of the row tile
    # -> row-tiled path (exercises fully-valid, boundary, and pure-pad tiles).
    C2, H2, W2, T2 = 3, 20, 24, 64
    x2 = jax.random.normal(jax.random.PRNGKey(1), (C2, H2, W2), dtype=jnp.float32)
    y2 = jax.block_until_ready(pad_to_square(x2, T2))
    ref2 = jnp.pad(x2, ((0, 0), (0, T2 - H2), (0, T2 - W2)), constant_values=0.0)
    assert y2.shape == (C2, T2, T2), y2.shape
    assert y2.dtype == x2.dtype
    np.testing.assert_allclose(np.asarray(y2), np.asarray(ref2), rtol=0, atol=0)

    # Case 3: already square -> short-circuit (no kernel launch, no copy).
    x3 = jax.random.normal(jax.random.PRNGKey(2), (1, 3, 32, 32), dtype=jnp.float32)
    y3 = jax.block_until_ready(pad_to_square(x3, 32))
    np.testing.assert_allclose(np.asarray(y3), np.asarray(x3), rtol=0, atol=0)

    print("KERNEL_OK")
</pallas_src>

<mosaic_0001>
module attributes {stable_mosaic.version = 11 : i64} {
  func.func @kernel(%arg0: i32, %arg1: memref<2x16x16xf32, #tpu.memory_space<vmem>>, %arg2: memref<2x32x32xf32, #tpu.memory_space<vmem>>) attributes {dimension_semantics = [#tpu.dimension_semantics<parallel>], iteration_bounds = array<i64: 4>, scalar_prefetch = 0 : i64, scratch_operands = 0 : i64, tpu.core_type = #tpu.core_type<tc>, window_params = [{transform_indices = @transform_0, window_bounds = array<i64: 2, 16, 16>}, {transform_indices = @transform_1, window_bounds = array<i64: 2, 32, 32>}]} {
    %c0 = arith.constant 0 : index
    %c0_0 = arith.constant 0 : index
    %c0_1 = arith.constant 0 : index
    %0 = vector.load %arg1[%c0, %c0_0, %c0_1] : memref<2x16x16xf32, #tpu.memory_space<vmem>>, vector<2x16x16xf32>
    %c0_2 = arith.constant 0 : index
    %c0_3 = arith.constant 0 : index
    %c0_4 = arith.constant 0 : index
    %1 = vector.load %arg2[%c0_2, %c0_3, %c0_4] : memref<2x32x32xf32, #tpu.memory_space<vmem>>, vector<2x16x16xf32>
    tpu.vector_store %arg2[%c0_2, %c0_3, %c0_4], %0 {strides = array<i32>} : memref<2x32x32xf32, #tpu.memory_space<vmem>>, vector<2x16x16xf32>,
    %cst = arith.constant 0.000000e+00 : f32
    %2 = vector.broadcast %cst : f32 to vector<2x16x16xf32>
    %c0_5 = arith.constant 0 : index
    %c0_6 = arith.constant 0 : index
    %c16 = arith.constant 16 : index
    %3 = vector.load %arg2[%c0_5, %c0_6, %c16] : memref<2x32x32xf32, #tpu.memory_space<vmem>>, vector<2x16x16xf32>
    tpu.vector_store %arg2[%c0_5, %c0_6, %c16], %2 {strides = array<i32>} : memref<2x32x32xf32, #tpu.memory_space<vmem>>, vector<2x16x16xf32>,
    %cst_7 = arith.constant 0.000000e+00 : f32
    %4 = vector.broadcast %cst_7 : f32 to vector<2x16x32xf32>
    %c0_8 = arith.constant 0 : index
    %c16_9 = arith.constant 16 : index
    %c0_10 = arith.constant 0 : index
    %5 = vector.load %arg2[%c0_8, %c16_9, %c0_10] : memref<2x32x32xf32, #tpu.memory_space<vmem>>, vector<2x16x32xf32>
    tpu.vector_store %arg2[%c0_8, %c16_9, %c0_10], %4 {strides = array<i32>} : memref<2x32x32xf32, #tpu.memory_space<vmem>>, vector<2x16x32xf32>,
    return
  }
  func.func @transform_0(%arg0: i32) -> (i32, i32, i32) {
    %c0_i32 = arith.constant 0 : i32
    %c0_i32_0 = arith.constant 0 : i32
    %c0_i32_1 = arith.constant 0 : i32
    return %arg0, %c0_i32, %c0_i32_0 : i32, i32, i32
  }
  func.func @transform_1(%arg0: i32) -> (i32, i32, i32) {
    %c0_i32 = arith.constant 0 : i32
    %c0_i32_0 = arith.constant 0 : i32
    %c0_i32_1 = arith.constant 0 : i32
    return %arg0, %c0_i32, %c0_i32_0 : i32, i32, i32
  }
}

</mosaic_0001>

<bundles_post_ra>
// kernel: tpu_custom_call.1
= control target key start
LH: loop header
LB: loop body
LE: loop exit
PB: predicated region body
PF: predicated region fallthrough
CT: control target
= control target key end

     0   :  { %6 = vsyncpa [#allocation3], 0  ;;  %s559_s0 = inlined_call_operand.hbm [shape: f32[8,16,16], index: 0, kind: input, shape index: {}]   ;;  %s560_s1 = inlined_call_operand.hbm [shape: f32[8,32,32], index: 1, kind: output, shape index: {}]  }
   0x1   :  { %8 = vsyncpa [#allocation3 + $0x1], 0 }
   0x2   :  { %9 = vsyncpa [#allocation4], 0 }
   0x3   :  { %11 = vsyncpa [#allocation4 + $0x1], 0  ;;  %s433_s6 = smov 0   ;;  %s435_s7 = smov 0  }
   0x4   :  { %s437_s8 = smov 0   ;;  %s439_s9 = smov 0  }
   0x5 LB: > { %s454_s10 = sadd.s32 4294967295, %s416_s9   ;;  %s249_s11 = sadd.s32 4294967294, %s416_s9   ;;  %s416_s9 = sphi %s439_s9, %s569_s9   ;;  %s412_s8 = sphi %s437_s8, %s568_s8   ;;  %s408_s7 = sphi %s435_s7, %s567_s7   ;;  %s404_s6 = sphi %s433_s6, %s566_s6  }
   0x6   : > { %s458_s12 = sadd.s32 1, %s416_s9   ;;  %s24_s13 = sadd.s32 1, %s412_s8 }
   0x7   : > { %s21_s14 = ssub.s32 %s416_s9, %s458_s12  ;;  %p31_p0 = scmp.ne.s32.totalorder %s412_s8, %s408_s7 }
   0x8   : > { %p22_p1 = scmp.eq.s32.totalorder %s21_s14, 0  ;;  %p32_p2 = scmp.eq.s32.totalorder %s416_s9, 0 }
   0x9   : > { %p37_p3 = scmp.ne.s32.totalorder %s408_s7, %s404_s6  ;;  %p38_p4 = scmp.eq.s32.totalorder %s454_s10, 0 }
   0xa   : > { %s470_s15 = scalar_select %p22_p1, %s412_s8, %s24_s13  }
   0xb   : > { %p472_p5 = por %p32_p2, %p31_p0  ;;  %p476_p6 = por %p38_p4, %p37_p3 }
   0xc   : > { %p61_p7 = scmp.eq.s32.totalorder %s454_s10, 3  ;;  %p67_p8 = scmp.eq.s32.totalorder %s249_s11, 3 }
   0xd   : > { %p281_p9 = scmp.lt.s32.totalorder %s416_s9, 4  ;;  %s87_s20 = sand.u32 1, %s412_s8  }
   0xe   : > { %p482_p10 = por %p61_p7, %p31_p0  ;;  %p486_p11 = por %p67_p8, %p37_p3 }
   0xf   : > { %s266_s21 = sshll.u32 %s416_s9, 5  ;;  %s252_s22 = sshll.u32 %s87_s20, 5 }
  0x10   : > { %s97_s25 = scalar_lea.hbm %s559_s0, %s266_s21  ;;  %s91_s27 = scalar_lea.vmem [#allocation2], %s252_s22 }
  0x11   : > { %s98_s26 = sshll.u32 %s97_s25, 4  ;;  %s100_s28 = sshll.u32 %s91_s27, 4  ;;  %s99_s26 = int_to_ptr.hbm [resolvable:$true] %s98_s26  ;;  %s101_s28 = int_to_ptr.vmem [resolvable:$true] %s100_s28 }
  0x12   : > { %p497_p12 = pnand %p281_p9, %p472_p5  ;;  %p256_p13 = scmp.ge.s32.totalorder %s416_s9, 1 }
  0x13   : > { %p108_p0 = scmp.lt.s32.totalorder %s416_s9, 5  ;;  %s88_s30 = scalar_lea.sflag [#allocation3], %s87_s20 }
  0x14   : > { %s320_s2 = sshra.s32 %s99_s26, 4  ;;  %p324_p2 = pneg %p497_p12  ;;  %s321_s2 = int_to_ptr.hbm [resolvable:$true] %s320_s2 }
  0x15   : > { %s322_s3 = scalar_lea.hbm %s321_s2, 32  ;;  %s327_s11 = scalar_lea.hbm %s559_s0, 128 }
  0x16   : > { %p323_p1 = scmp.ne.s32.totalorder %s321_s2, %s322_s3  ;;  %p328_p5 = scmp.lt.s32.totalorder %s321_s2, %s559_s0 }
  0x17   : > { %p329_p7 = scmp.lt.s32.totalorder %s327_s11, %s322_s3 }
  0x18   : > { %p325_p3 = pnand %p324_p2, %p323_p1 }
  0x19   : > { %p330_p8 = por %p329_p7, %p328_p5 }
  0x1a   : > { %p326_p4 = pneg %p325_p3 }
  0x1c   : > { %p331_p9 = pnand %p330_p8, %p326_p4 }
  0x1e   : > { %334 = shalt.err (!%p331_p9)
}
  0x1f   : > { %s418_s16 = smov 128   ;;  %s419_s20 = smov 8  }
  0x20   : > { %276 = dma.hbm_to_vmem [thread:$0]  (!%p497_p12), %s99_s26, 512, %s101_s28, %s88_s30, %s418_s16, %s418_s16, %s419_s20  }
  0x21   : > { %p109_p1 = pnand %p256_p13, %p108_p0 }
  0x22   : > { %s518_s21 = sand.u32 (!%p109_p1), 1, %s408_s7  }
  0x23   : > { %112 = sbr.rel (%p109_p1) target bundleno = 58 (0x3a), region = 24  ;;  %s257_s22 = sshll.u32 (!%p109_p1), %s518_s21, 5 }
  0x24   : > { %s115_s23 = scalar_lea.sflag (!%p109_p1), [#allocation3], %s518_s21  ;;  %s118_s24 = scalar_lea.vmem (!%p109_p1), [#allocation2], %s257_s22 }
  0x28   : > { %395 = dma.done.wait (%p476_p6), %s115_s23, 512  }
  0x29   : > { %397 = vsyncadd (%p476_p6), %s115_s23, 4294966784  ;;  %s258_s25 = sshll.u32 %s518_s21, 6  ;;  %vm154_vm0 = vcmask 261120   ;;  %v420_v0 = vmov 0.0   ;;  %s268_s27 = sshll.u32 %s454_s10, 6  ;;  %vm144_vm1 = vcmask 130048  }
  0x2a   : > { %s137_s26 = scalar_lea.vmem [#allocation5], %s258_s25  ;;  %v140_v1 = vld [vmem:[%s118_s24] sm:$0xff]  ;;  %v141_v2 = vld [vmem:[%s118_s24 + $0x8] sm:$0xff]  ;;  %v142_v3 = vld [vmem:[%s118_s24 + $0x10] sm:$0xff]  ;;  %s172_s17 = scalar_lea.hbm %s560_s1, %s268_s27  ;;  %vm149_vm2 = vcmask 261248  }
  0x2b   : > { %155 = vst.msk [vmem:[%s137_s26 + $0x10] sm:$0xff] %vm154_vm0, %v420_v0  ;;  %v143_v4 = vld [vmem:[%s118_s24 + $0x18] sm:$0xff]  ;;  %s173_s30 = sshll.u32 %s137_s26, 4  ;;  %s175_s2 = sshll.u32 %s172_s17, 4  ;;  %s174_s30 = int_to_ptr.vmem [resolvable:$true] %s173_s30  ;;  %s176_s2 = int_to_ptr.hbm [resolvable:$true] %s175_s2 }
  0x2c   : > { %156 = vst.msk [vmem:[%s137_s26 + $0x18] sm:$0xff] %vm154_vm0, %v420_v0  ;;  %s160_s10 = scalar_lea.sflag [#allocation4], %s518_s21  ;;  %s364_s3 = sshra.s32 %s176_s2, 4  ;;  %s365_s3 = int_to_ptr.hbm [resolvable:$true] %s364_s3 }
  0x2d   : > { %157 = vst.msk [vmem:[%s137_s26 + $0x30] sm:$0xff] %vm154_vm0, %v420_v0  ;;  %s366_s4 = scalar_lea.hbm %s365_s3, 64  ;;  %s370_s13 = scalar_lea.hbm %s560_s1, 256 }
  0x2e   : > { %158 = vst.msk [vmem:[%s137_s26 + $0x38] sm:$0xff] %vm154_vm0, %v420_v0  ;;  %p367_p6 = scmp.ne.s32.totalorder %s365_s3, %s366_s4  ;;  %p371_p0 = scmp.lt.s32.totalorder %s365_s3, %s560_s1 }
  0x2f   : > { %145 = vst.msk [vmem:[%s137_s26] sm:$0xff] %vm144_vm1, %v140_v1  ;;  %p372_p2 = scmp.lt.s32.totalorder %s370_s13, %s366_s4 }
  0x30   : > { %146 = vst.msk [vmem:[%s137_s26 + $0x8] sm:$0xff] %vm144_vm1, %v141_v2  ;;  %p368_p12 = pnand %p367_p6, %p482_p10 }
  0x31   : > { %147 = vst.msk [vmem:[%s137_s26 + $0x20] sm:$0xff] %vm144_vm1, %v142_v3  ;;  %p373_p3 = por %p372_p2, %p371_p0 }
  0x32   : > { %148 = vst.msk [vmem:[%s137_s26 + $0x28] sm:$0xff] %vm144_vm1, %v143_v4  ;;  %p369_p13 = pneg %p368_p12 }
  0x33   : > { %150 = vst.msk [vmem:[%s137_s26] sm:$0xff] %vm149_vm2, %v420_v0 }
  0x34   : > { %151 = vst.msk [vmem:[%s137_s26 + $0x8] sm:$0xff] %vm149_vm2, %v420_v0  ;;  %p374_p4 = pnand %p373_p3, %p369_p13 }
  0x35   : > { %152 = vst.msk [vmem:[%s137_s26 + $0x20] sm:$0xff] %vm149_vm2, %v420_v0 }
  0x36   : > { %153 = vst.msk [vmem:[%s137_s26 + $0x28] sm:$0xff] %vm149_vm2, %v420_v0 }
  0x37   : > { %377 = shalt.err (!%p374_p4)
}
  0x38   : > { %s421_s20 = smov 128   ;;  %s422_s21 = smov 8  }
  0x39   : > { %271 = dma.vmem_to_hbm [thread:$0]  (%p482_p10), %s174_s30, 1024, %s176_s2, %s160_s10, %s421_s20, %s421_s20, %s422_s21  }
  0x3a PF: > { %p282_p5 = scmp.ge.s32.totalorder %s416_s9, 2  ;;  %s190_s22 = sand.u32 1, %s404_s6  }
  0x3b   : > { %s191_s23 = scalar_lea.sflag [#allocation4], %s190_s22 }
  0x3c   : > { %p278_p7 = pnand %p282_p5, %p486_p11 }
  0x3e   : > { %p279_p8 = pneg %p278_p7 }
  0x40   : > { %399 = dma.done.wait (%p279_p8), %s191_s23, 1024  }
  0x41   : > { %401 = vsyncadd (%p279_p8), %s191_s23, 4294966272  ;;  %p14_p9 = scmp.ge.s32.totalorder %s458_s12, 6   ;;  %s566_s6 = smov %s408_s7 }
  0x42   : > { %s567_s7 = smov %s412_s8  ;;  %s568_s8 = smov %s470_s15 }
  0x43   : > { %s569_s9 = smov %s458_s12  ;;  %16 = sbr.rel (!%p14_p9) target bundleno = 5 (0x5), region = 69 }
  0x48   :  { %197 = vsyncpa [#allocation3], 1 }
  0x49   :  { %199 = vsyncpa [#allocation3 + $0x1], 1 }
  0x4a   :  { %200 = vsyncpa [#allocation4], 1 }
  0x4b   :  { %202 = vsyncpa [#allocation4 + $0x1], 1 }

</bundles_post_ra>
